<compile_context>
chip_gen: v7x
topology: tpu7x:2x2x1
jax: 0.10.0
libtpu: 0.0.40
codegen_flags: <defaults>
</compile_context>

<pallas_src>
import math

import jax
import jax.numpy as jnp
from jax.experimental import pallas as pl
from jax.experimental.pallas import tpu as pltpu

_LANE = 128
_SUBLANE = 8
_TARGET_BLOCK_BYTES = 4 << 20   # ~4 MiB per input block (2 inputs x 2 buffers = 16 MiB)

MODELS_TENSOR_PREDICTIONS_KEY = "models_tensor_predictions"
GT_TENSOR_PREDICTIONS_KEY = "gt_tensor_predictions"
GT_TENSOR_INPUTS_KEY = "gt_tensor_inputs"
OTHER_KEY = "other"

_NUM_CHUNKS_CACHE = None


def _round_up(x: int, m: int) -> int:
    return ((x + m - 1) // m) * m


def _cdiv(a: int, b: int) -> int:
    return (a + b - 1) // b


def _default_num_chunks() -> int:
    """Grid-parallel chunk count.  >1 only pays off on chips that expose two
    TensorCores behind one device (megacore: v4 / v5p / v7x); on v5e/v6e it would
    just inflate padding and add a wrapper combine."""
    global _NUM_CHUNKS_CACHE
    if _NUM_CHUNKS_CACHE is not None:
        return _NUM_CHUNKS_CACHE
    chunks = 1
    try:
        kind = jax.devices()[0].device_kind.lower()
        if any(tag in kind for tag in ("v4", "v5p", "v7", "tpu7", "ironwood")):
            chunks = 2
    except Exception:
        chunks = 1
    _NUM_CHUNKS_CACHE = chunks
    return chunks


def _make_kernel(*, batch, tile_rows, group_rows, rows_valid, steps,
                 need_row_mask, with_pred):
    """Streaming sumsq + per-batch max|diff| kernel over (batch, tile_rows, 128) blocks.

    If `with_pred`, a third input block carries an f32 {0,1} mask (shared across the
    batch) and the sumsq accumulator only collects masked contributions, while the
    per-batch max stays unmasked.
    """
    groups = tile_rows // group_rows           # packed sublane groups per block
    spg = group_rows // _SUBLANE               # sublane-groups per row-group (1 for f32)

    def _process_group(g, a_ref, b_ref, pm_ref, sumsq_ref, bmax_ref, row_start):
        r0 = g * group_rows
        if not isinstance(g, int):
            r0 = pl.multiple_of(r0, group_rows)
        a = a_ref[:, pl.ds(r0, group_rows), :].astype(jnp.float32)
        b = b_ref[:, pl.ds(r0, group_rows), :].astype(jnp.float32)
        d = a - b

        valid = None
        if need_row_mask:
            # Rows past the array extent (overhanging last block / clamped duplicate
            # blocks) hold unspecified data -> zero them before square / abs.
            srow = jax.lax.broadcasted_iota(jnp.int32, (group_rows, _LANE), 0)
            valid = (row_start + r0 + srow) < rows_valid
            d = jnp.where(valid[None, :, :], d, 0.0)

        sq = d * d
        ad = jnp.abs(d)

        if with_pred:
            pm = pm_ref[pl.ds(r0, group_rows), :]
            if need_row_mask:
                pm = jnp.where(valid, pm, 0.0)     # mask rows of the partial block too
            sq = sq * pm[None, :, :]

        # Fold (batch, group_rows, 128) into the resident (8, 128) / (batch, 8, 128)
        # accumulators with pure per-vreg VPU adds/maxes; no cross-lane reduces here.
        if spg == 1:
            sq_f = jnp.sum(sq, axis=0)
            mx_f = ad
        else:
            sq_f = jnp.sum(sq.reshape(batch * spg, _SUBLANE, _LANE), axis=0)
            mx_f = jnp.max(ad.reshape(batch, spg, _SUBLANE, _LANE), axis=1)

        sumsq_ref[...] += sq_f
        bmax_ref[...] = jnp.maximum(bmax_ref[...], mx_f)

    def kernel(*refs):
        if with_pred:
            a_ref, b_ref, pm_ref, sumsq_ref, bmax_ref = refs
        else:
            a_ref, b_ref, sumsq_ref, bmax_ref = refs
            pm_ref = None

        step = pl.program_id(1)

        @pl.when(step == 0)
        def _init():
            sumsq_ref[...] = jnp.zeros_like(sumsq_ref)
            bmax_ref[...] = jnp.zeros_like(bmax_ref)

        # Logical (un-clamped) row offset of this block: duplicated (clamped) blocks
        # get logical rows >= rows_valid and are therefore fully masked out.
        row_start = (pl.program_id(0) * steps + step) * tile_rows

        if groups <= 8:
            # Short fixed trip count: unroll at trace time.
            for g in range(groups):
                _process_group(g, a_ref, b_ref, pm_ref, sumsq_ref, bmax_ref, row_start)
        else:
            def body(g, carry):
                _process_group(g, a_ref, b_ref, pm_ref, sumsq_ref, bmax_ref, row_start)
                return carry
            jax.lax.fori_loop(0, groups, body, 0)

    return kernel


def _pair_reduction(a: jax.Array, b: jax.Array, pred_cfg=None):
    """One HBM pass over (a, b).

    Returns (sumsq, per_batch_max_abs) where sumsq = sum((a-b)^2) over all elements,
    or, if pred_cfg=(inner, t_dim, s_p) is given, only over elements whose timestep
    index along dim 2 of the original tensors is < s_p.  The per-batch max |a-b| is
    always over ALL elements.
    """
    assert a.shape == b.shape, "operands must have identical shapes"
    assert a.ndim >= 2, "expects a leading batch dimension"
    batch = a.shape[0]
    per_batch = a.size // batch
    itemsize = jnp.dtype(a.dtype).itemsize
    group_rows = _SUBLANE * max(1, 4 // itemsize)   # 8 rows f32, 16 bf16, 32 int8/fp8

    rows_pb = _cdiv(per_batch, _LANE)

    # Lane-dense (batch, rows, 128) slab.  Fast path: pure reshape, no HBM copy.
    if per_batch % _LANE == 0 and rows_pb >= group_rows:
        rows_arr = rows_pb

        def prep(t):
            return t.reshape(batch, rows_arr, _LANE)
    else:
        # Ragged / tiny tail: minimal zero pad (neutral for both sumsq and abs-max).
        rows_arr = max(_round_up(rows_pb, group_rows), group_rows)
        pad = rows_arr * _LANE - per_batch

        def prep(t):
            return jnp.pad(t.reshape(batch, per_batch),
                           ((0, 0), (0, pad))).reshape(batch, rows_arr, _LANE)

    a3, b3 = prep(a), prep(b)

    # Row tile: as large as the ~4 MiB/input budget allows, a multiple of the packed
    # sublane group, and never larger than the rows dim (blocks never exceed the array).
    target = _TARGET_BLOCK_BYTES // max(1, batch * _LANE * itemsize)
    target = max(group_rows, (target // group_rows) * group_rows)
    cap = max(group_rows, (rows_arr // group_rows) * group_rows)
    tile_rows = min(target, cap)

    num_row_tiles = _cdiv(rows_arr, tile_rows)
    chunks = min(_default_num_chunks(), num_row_tiles)
    steps = _cdiv(num_row_tiles, chunks)
    need_row_mask = (chunks * steps * tile_rows != rows_arr)

    if chunks * steps == num_row_tiles:
        def row_block(c, i):
            return c * steps + i
    else:
        last_tile = num_row_tiles - 1

        def row_block(c, i):
            # Clamp so DMAs never start past the array; duplicated blocks are fully
            # masked out in-kernel via their (logical) row indices.
            return jnp.minimum(c * steps + i, last_tile)

    with_pred = pred_cfg is not None
    operands = [a3, b3]
    in_specs = [
        pl.BlockSpec((batch, tile_rows, _LANE), lambda c, i: (0, row_block(c, i), 0)),
        pl.BlockSpec((batch, tile_rows, _LANE), lambda c, i: (0, row_block(c, i), 0)),
    ]
    if with_pred:
        inner, t_dim, s_p = pred_cfg
        # f32 {0,1} mask over the per-batch flat index (shared across the batch):
        # element f belongs to the first s_p timesteps iff ((f // inner) % t_dim) < s_p.
        # Built once in XLA; its HBM traffic is <= per_batch*4 bytes per pass.
        flat = jnp.arange(rows_arr * _LANE, dtype=jnp.int32)
        pm = ((flat // inner) % t_dim < s_p).astype(jnp.float32).reshape(rows_arr, _LANE)
        operands.append(pm)
        in_specs.append(
            pl.BlockSpec((tile_rows, _LANE), lambda c, i: (row_block(c, i), 0)))

    kernel = _make_kernel(batch=batch, tile_rows=tile_rows, group_rows=group_rows,
                          rows_valid=rows_arr, steps=steps,
                          need_row_mask=need_row_mask, with_pred=with_pred)

    n = batch * rows_arr * _LANE
    out_bytes = 4 * chunks * (1 + batch) * _SUBLANE * _LANE
    cost = pl.CostEstimate(
        flops=(7 if with_pred else 5) * n,
        transcendentals=0,
        bytes_accessed=2 * n * itemsize
        + (rows_arr * _LANE * 4 if with_pred else 0) + out_bytes,
    )

    in_block_bytes = batch * tile_rows * _LANE * itemsize
    vmem_need = (4 * in_block_bytes                       # 2 inputs x 2 buffers
                 + (2 * tile_rows * _LANE * 4 if with_pred else 0)
                 + 2 * out_bytes + (4 << 20))             # accumulators + headroom
    vmem_limit = int(max(vmem_need, 24 << 20))

    sumsq_chunks, bmax_chunks = pl.pallas_call(
        kernel,
        out_shape=(
            jax.ShapeDtypeStruct((chunks, _SUBLANE, _LANE), jnp.float32),
            jax.ShapeDtypeStruct((chunks, batch, _SUBLANE, _LANE), jnp.float32),
        ),
        grid_spec=pltpu.PrefetchScalarGridSpec(
            num_scalar_prefetch=0,
            grid=(chunks, steps),
            in_specs=in_specs,
            out_specs=[
                pl.BlockSpec((None, _SUBLANE, _LANE), lambda c, i: (c, 0, 0)),
                pl.BlockSpec((None, batch, _SUBLANE, _LANE), lambda c, i: (c, 0, 0, 0)),
            ],
        ),
        compiler_params=pltpu.CompilerParams(
            # Chunk axis: each chunk owns its output blocks -> parallel (megacore).
            # Row-tile axis: resident-accumulator reduction -> arbitrary.
            dimension_semantics=("parallel", "arbitrary"),
            vmem_limit_bytes=vmem_limit,
        ),
        cost_estimate=cost,
    )(*operands)

    sumsq = jnp.sum(sumsq_chunks)                        # tiny final reduce in XLA
    batch_max = jnp.max(bmax_chunks, axis=(0, 2, 3))     # (batch,)
    return sumsq, batch_max


class UniversalLinearEmbeddingLoss:
    """JAX/Pallas port of the PyTorch UniversalLinearEmbeddingLoss module."""

    def __init__(self, alpha_1: float, alpha_2: float, s_p: int):
        self._alpha_1 = alpha_1
        self._alpha_2 = alpha_2
        self._s_p = s_p

    def __call__(self, inputs: dict) -> jax.Array:
        return self.forward(inputs)

    def forward(self, inputs: dict) -> jax.Array:
        x = inputs[GT_TENSOR_INPUTS_KEY]
        x_recon = inputs[OTHER_KEY]["reconstruction"]
        y = inputs[GT_TENSOR_PREDICTIONS_KEY]
        y_pred = inputs[MODELS_TENSOR_PREDICTIONS_KEY]
        states_0 = inputs[OTHER_KEY]["states_0"]
        states_1 = inputs[OTHER_KEY]["states_1"]

        # Reconstruction MSE + its per-batch inf-norm: one fused pass over (x, x_recon).
        recon_sumsq, recon_bmax = _pair_reduction(x, x_recon)
        recon_loss = recon_sumsq / x.size

        # Prediction: ONE pass over the full (y, y_pred) yields both the s_p-masked
        # MSE numerator and the full-tensor per-batch inf-norm (no slice, no 2nd pass).
        t_dim = y.shape[2]
        inner = math.prod(y.shape[3:]) if y.ndim > 3 else 1
        s_p_eff = min(self._s_p, t_dim)
        pred_sumsq, pred_bmax = _pair_reduction(y, y_pred,
                                                pred_cfg=(inner, t_dim, s_p_eff))
        pred_count = y.shape[0] * y.shape[1] * s_p_eff * inner
        pred_loss = pred_sumsq / pred_count

        # Linearity MSE between shifted embeddings.
        # TODO(synk): the one-timestep shift could be folded into the kernel (offset
        # index maps) to skip these two slice copies when the state tensors are large.
        emb_t = states_1[:, :, :-1, :]
        emb_t1 = states_0[:, :, 1:, :]
        lin_sumsq, _ = _pair_reduction(emb_t, emb_t1)
        lin_loss = lin_sumsq / emb_t.size

        inf_loss = jnp.mean(recon_bmax) + jnp.mean(pred_bmax)

        return (self._alpha_1 * (recon_loss + pred_loss)
                + lin_loss
                + self._alpha_2 * inf_loss)


def _reference_loss(inputs, alpha_1, alpha_2, s_p):
    x = inputs[GT_TENSOR_INPUTS_KEY]
    x_recon = inputs[OTHER_KEY]["reconstruction"]
    y = inputs[GT_TENSOR_PREDICTIONS_KEY]
    y_pred = inputs[MODELS_TENSOR_PREDICTIONS_KEY]
    s0 = inputs[OTHER_KEY]["states_0"]
    s1 = inputs[OTHER_KEY]["states_1"]

    mse = lambda a, b: jnp.mean((a - b) ** 2)
    recon = mse(x, x_recon)
    pred = mse(y[:, :, :s_p], y_pred[:, :, :s_p])
    lin = mse(s1[:, :, :-1, :], s0[:, :, 1:, :])
    inf1 = jnp.mean(jnp.max(jnp.abs(x - x_recon).reshape(x.shape[0], -1), axis=1))
    inf2 = jnp.mean(jnp.max(jnp.abs(y - y_pred).reshape(y.shape[0], -1), axis=1))
    return alpha_1 * (recon + pred) + lin + alpha_2 * (inf1 + inf2)


if __name__ == "__main__":
    key = jax.random.PRNGKey(0)
    ks = jax.random.split(key, 10)

    B, C, H, W = 2, 4, 16, 16      # x / reconstruction (NCHW)
    T, D = 16, 16                  # prediction trajectories (B, C, T, D)
    S, E = 8, 32                   # embedding states (B, C, S, E)
    alpha_1, alpha_2, s_p = 0.1, 1e-2, 8

    inputs = {
        GT_TENSOR_INPUTS_KEY: jax.random.normal(ks[0], (B, C, H, W), jnp.float32),
        GT_TENSOR_PREDICTIONS_KEY: jax.random.normal(ks[1], (B, C, T, D), jnp.float32),
        MODELS_TENSOR_PREDICTIONS_KEY: jax.random.normal(ks[2], (B, C, T, D), jnp.float32),
        OTHER_KEY: {
            "reconstruction": jax.random.normal(ks[3], (B, C, H, W), jnp.float32),
            "states_0": jax.random.normal(ks[4], (B, C, S, E), jnp.float32),
            "states_1": jax.random.normal(ks[5], (B, C, S, E), jnp.float32),
        },
    }

    loss_fn = UniversalLinearEmbeddingLoss(alpha_1=alpha_1, alpha_2=alpha_2, s_p=s_p)
    loss = jax.block_until_ready(loss_fn(inputs))
    ref = jax.block_until_ready(_reference_loss(inputs, alpha_1, alpha_2, s_p))
    assert jnp.allclose(loss, ref, rtol=1e-5, atol=1e-6), (loss, ref)

    # Extra check 1: ragged row count (23 rows of 128 lanes) exercises the multi-step
    # accumulation and the in-kernel row-validity mask on the overhanging last block.
    a = jax.random.normal(ks[6], (2, 23, 128), jnp.float32)
    b = jax.random.normal(ks[7], (2, 23, 128), jnp.float32)
    ss, bm = _pair_reduction(a, b)
    ss, bm = jax.block_until_ready((ss, bm))
    assert jnp.allclose(ss, jnp.sum((a - b) ** 2), rtol=1e-5, atol=1e-4)
    assert jnp.allclose(bm, jnp.max(jnp.abs(a - b).reshape(2, -1), axis=1),
                        rtol=1e-6, atol=1e-6)

    # Extra check 2: non-lane-aligned per-batch size exercises the minimal-pad path.
    a = jax.random.normal(ks[8], (2, 3, 5, 7), jnp.float32)
    b = jax.random.normal(ks[9], (2, 3, 5, 7), jnp.float32)
    ss, bm = _pair_reduction(a, b)
    ss, bm = jax.block_until_ready((ss, bm))
    assert jnp.allclose(ss, jnp.sum((a - b) ** 2), rtol=1e-5, atol=1e-4)
    assert jnp.allclose(bm, jnp.max(jnp.abs(a - b).reshape(2, -1), axis=1),
                        rtol=1e-6, atol=1e-6)

    print("KERNEL_OK")
</pallas_src>

<mosaic_0001>
module attributes {stable_mosaic.version = 11 : i64} {
  func.func @kernel(%arg0: i32, %arg1: i32, %arg2: memref<2x8x128xf32, #tpu.memory_space<vmem>>, %arg3: memref<2x8x128xf32, #tpu.memory_space<vmem>>, %arg4: memref<1x8x128xf32, #tpu.memory_space<vmem>>, %arg5: memref<1x2x8x128xf32, #tpu.memory_space<vmem>>) attributes {dimension_semantics = [#tpu.dimension_semantics<parallel>, #tpu.dimension_semantics<arbitrary>], iteration_bounds = array<i64: 1, 1>, scalar_prefetch = 0 : i64, scratch_operands = 0 : i64, tpu.core_type = #tpu.core_type<tc>, window_params = [{transform_indices = @transform_0, window_bounds = array<i64: 2, 8, 128>}, {transform_indices = @transform_1, window_bounds = array<i64: 2, 8, 128>}, {transform_indices = @transform_2, window_bounds = array<i64: 1, 8, 128>}, {transform_indices = @transform_3, window_bounds = array<i64: 1, 2, 8, 128>}]} {
    %c0_i32 = arith.constant 0 : i32
    %0 = arith.cmpi eq, %arg1, %c0_i32 : i32
    %1 = arith.extui %0 : i1 to i32
    %c0_i32_0 = arith.constant 0 : i32
    %2 = arith.cmpi ne, %1, %c0_i32_0 : i32
    scf.if %2 {
      %cst_20 = arith.constant 0.000000e+00 : f32
      %21 = vector.broadcast %cst_20 : f32 to vector<8x128xf32>
      %c0_21 = arith.constant 0 : index
      %c0_22 = arith.constant 0 : index
      %c0_23 = arith.constant 0 : index
      %22 = vector.load %arg4[%c0_21, %c0_22, %c0_23] : memref<1x8x128xf32, #tpu.memory_space<vmem>>, vector<1x8x128xf32>
      %23 = vector.shape_cast %22 : vector<1x8x128xf32> to vector<8x128xf32>
      %24 = vector.shape_cast %21 : vector<8x128xf32> to vector<1x8x128xf32>
      tpu.vector_store %arg4[%c0_21, %c0_22, %c0_23], %24 {strides = array<i32>} : memref<1x8x128xf32, #tpu.memory_space<vmem>>, vector<1x8x128xf32>,
      %cst_24 = arith.constant 0.000000e+00 : f32
      %25 = vector.broadcast %cst_24 : f32 to vector<2x8x128xf32>
      %c0_25 = arith.constant 0 : index
      %c0_26 = arith.constant 0 : index
      %c0_27 = arith.constant 0 : index
      %c0_28 = arith.constant 0 : index
      %26 = vector.load %arg5[%c0_25, %c0_26, %c0_27, %c0_28] : memref<1x2x8x128xf32, #tpu.memory_space<vmem>>, vector<1x2x8x128xf32>
      %27 = vector.shape_cast %26 : vector<1x2x8x128xf32> to vector<2x8x128xf32>
      %28 = vector.shape_cast %25 : vector<2x8x128xf32> to vector<1x2x8x128xf32>
      tpu.vector_store %arg5[%c0_25, %c0_26, %c0_27, %c0_28], %28 {strides = array<i32>} : memref<1x2x8x128xf32, #tpu.memory_space<vmem>>, vector<1x2x8x128xf32>,
    } else {
    }
    %c0 = arith.constant 0 : index
    %c0_1 = arith.constant 0 : index
    %c0_2 = arith.constant 0 : index
    %3 = vector.load %arg2[%c0, %c0_1, %c0_2] : memref<2x8x128xf32, #tpu.memory_space<vmem>>, vector<2x8x128xf32>
    %c0_3 = arith.constant 0 : index
    %c0_4 = arith.constant 0 : index
    %c0_5 = arith.constant 0 : index
    %4 = vector.load %arg3[%c0_3, %c0_4, %c0_5] : memref<2x8x128xf32, #tpu.memory_space<vmem>>, vector<2x8x128xf32>
    %5 = arith.subf %3, %4 : vector<2x8x128xf32>
    %6 = arith.mulf %5, %5 : vector<2x8x128xf32>
    %7 = math.absf %5 : vector<2x8x128xf32>
    %cst = arith.constant dense<0.000000e+00> : vector<8x128xf32>
    %8 = vector.multi_reduction <add>, %6, %cst [0] : vector<2x8x128xf32> to vector<8x128xf32>
    %c0_6 = arith.constant 0 : index
    %c0_7 = arith.constant 0 : index
    %c0_8 = arith.constant 0 : index
    %9 = vector.load %arg4[%c0_6, %c0_7, %c0_8] : memref<1x8x128xf32, #tpu.memory_space<vmem>>, vector<1x8x128xf32>
    %10 = vector.shape_cast %9 : vector<1x8x128xf32> to vector<8x128xf32>
    %11 = arith.addf %10, %8 : vector<8x128xf32>
    %c0_9 = arith.constant 0 : index
    %c0_10 = arith.constant 0 : index
    %c0_11 = arith.constant 0 : index
    %12 = vector.load %arg4[%c0_9, %c0_10, %c0_11] : memref<1x8x128xf32, #tpu.memory_space<vmem>>, vector<1x8x128xf32>
    %13 = vector.shape_cast %12 : vector<1x8x128xf32> to vector<8x128xf32>
    %14 = vector.shape_cast %11 : vector<8x128xf32> to vector<1x8x128xf32>
    tpu.vector_store %arg4[%c0_9, %c0_10, %c0_11], %14 {strides = array<i32>} : memref<1x8x128xf32, #tpu.memory_space<vmem>>, vector<1x8x128xf32>,
    %c0_12 = arith.constant 0 : index
    %c0_13 = arith.constant 0 : index
    %c0_14 = arith.constant 0 : index
    %c0_15 = arith.constant 0 : index
    %15 = vector.load %arg5[%c0_12, %c0_13, %c0_14, %c0_15] : memref<1x2x8x128xf32, #tpu.memory_space<vmem>>, vector<1x2x8x128xf32>
    %16 = vector.shape_cast %15 : vector<1x2x8x128xf32> to vector<2x8x128xf32>
    %17 = arith.maximumf %16, %7 : vector<2x8x128xf32>
    %c0_16 = arith.constant 0 : index
    %c0_17 = arith.constant 0 : index
    %c0_18 = arith.constant 0 : index
    %c0_19 = arith.constant 0 : index
    %18 = vector.load %arg5[%c0_16, %c0_17, %c0_18, %c0_19] : memref<1x2x8x128xf32, #tpu.memory_space<vmem>>, vector<1x2x8x128xf32>
    %19 = vector.shape_cast %18 : vector<1x2x8x128xf32> to vector<2x8x128xf32>
    %20 = vector.shape_cast %17 : vector<2x8x128xf32> to vector<1x2x8x128xf32>
    tpu.vector_store %arg5[%c0_16, %c0_17, %c0_18, %c0_19], %20 {strides = array<i32>} : memref<1x2x8x128xf32, #tpu.memory_space<vmem>>, vector<1x2x8x128xf32>,
    return
  }
  func.func @transform_0(%arg0: i32, %arg1: i32) -> (i32, i32, i32) {
    %c1_i32 = arith.constant 1 : i32
    %0 = arith.muli %arg0, %c1_i32 : i32
    %1 = arith.addi %0, %arg1 : i32
    %c0_i32 = arith.constant 0 : i32
    %c0_i32_0 = arith.constant 0 : i32
    %c0_i32_1 = arith.constant 0 : i32
    return %c0_i32, %1, %c0_i32_0 : i32, i32, i32
  }
  func.func @transform_1(%arg0: i32, %arg1: i32) -> (i32, i32, i32) {
    %c1_i32 = arith.constant 1 : i32
    %0 = arith.muli %arg0, %c1_i32 : i32
    %1 = arith.addi %0, %arg1 : i32
    %c0_i32 = arith.constant 0 : i32
    %c0_i32_0 = arith.constant 0 : i32
    %c0_i32_1 = arith.constant 0 : i32
    return %c0_i32, %1, %c0_i32_0 : i32, i32, i32
  }
  func.func @transform_2(%arg0: i32, %arg1: i32) -> (i32, i32, i32) {
    %c0_i32 = arith.constant 0 : i32
    %c0_i32_0 = arith.constant 0 : i32
    %c0_i32_1 = arith.constant 0 : i32
    return %arg0, %c0_i32, %c0_i32_0 : i32, i32, i32
  }
  func.func @transform_3(%arg0: i32, %arg1: i32) -> (i32, i32, i32, i32) {
    %c0_i32 = arith.constant 0 : i32
    %c0_i32_0 = arith.constant 0 : i32
    %c0_i32_1 = arith.constant 0 : i32
    %c0_i32_2 = arith.constant 0 : i32
    return %arg0, %c0_i32, %c0_i32_0, %c0_i32_1 : i32, i32, i32, i32
  }
}

</mosaic_0001>

<bundles_post_ra>
// kernel: tpu_custom_call.1
= control target key start
LH: loop header
LB: loop body
LE: loop exit
PB: predicated region body
PF: predicated region fallthrough
CT: control target
= control target key end

     0   :  { %9 = vsyncpa [#allocation3], 0  ;;  %s296_s0 = inlined_call_operand.hbm [shape: f32[2,8,128], index: 0, kind: input, shape index: {}]   ;;  %s297_s1 = inlined_call_operand.hbm [shape: f32[2,8,128], index: 1, kind: input, shape index: {}]   ;;  %s298_s2 = inlined_call_operand.hbm [shape: f32[1,8,128], index: 2, kind: output, shape index: {0}]   ;;  %s299_s3 = inlined_call_operand.hbm [shape: f32[1,2,8,128], index: 3, kind: output, shape index: {1}]  }
   0x1   :  { %10 = vsyncpa [#allocation6], 0 }
   0x2   :  { %11 = vsyncpa [#allocation4], 0 }
   0x3   :  { %12 = vsyncpa [#allocation9], 0  ;;  %s213_s12 = smov [#allocation2]   ;;  %s117_s16 = scalar_lea.hbm %s296_s0, 256 }
   0x4   :  { %s21_s13 = sshll.u32 %s213_s12, 4  ;;  %p118_p0 = scmp.ne.s32.totalorder %s296_s0, %s117_s16  ;;  %s22_s13 = int_to_ptr.vmem [resolvable:$true] %s21_s13 }
   0x5   :  { %p121_p1 = scmp.lt.u32.totalorder %s117_s16, %s296_s0 }
   0x7   :  { %p123_p2 = pnand %p121_p1, %p118_p0 }
   0x9   :  { %126 = shalt.err (!%p123_p2)
}
   0xa   :  { %s127_s21 = scalar_lea.vmem %s22_s13, 256  ;;  %p132_p4 = scmp.lt.s32.totalorder %s22_s13, %s22_s13 }
   0xb   :  { %p128_p3 = scmp.ne.s32.totalorder %s22_s13, %s127_s21  ;;  %p133_p5 = scmp.lt.s32.totalorder %s127_s21, %s127_s21 }
   0xd   :  { %p134_p6 = por %p133_p5, %p132_p4 }
   0xf   :  { %p135_p7 = pnand %p134_p6, %p128_p3 }
  0x11   :  { %138 = shalt.err (!%p135_p7)
}
  0x12   :  { %s214_s22 = smov 128   ;;  %s215_s23 = smov 8  }
  0x13   :  { %27 = dma.hbm_to_vmem [thread:$0]  %s296_s0, 256, %s22_s13, [#allocation3], %s214_s22, %s214_s22, %s215_s23  }
  0x14   :  { %s216_s26 = smov [#allocation5]   ;;  %s139_s30 = scalar_lea.hbm %s297_s1, 256 }
  0x15   :  { %s36_s27 = sshll.u32 %s216_s26, 4  ;;  %p140_p8 = scmp.ne.s32.totalorder %s297_s1, %s139_s30  ;;  %s37_s27 = int_to_ptr.vmem [resolvable:$true] %s36_s27 }
  0x16   :  { %p143_p9 = scmp.lt.u32.totalorder %s139_s30, %s297_s1 }
  0x18   :  { %p145_p10 = pnand %p143_p9, %p140_p8 }
  0x1a   :  { %148 = shalt.err (!%p145_p10)
}
  0x1b   :  { %s149_s8 = scalar_lea.vmem %s37_s27, 256  ;;  %p154_p12 = scmp.lt.s32.totalorder %s37_s27, %s37_s27 }
  0x1c   :  { %p150_p11 = scmp.ne.s32.totalorder %s37_s27, %s149_s8  ;;  %p155_p13 = scmp.lt.s32.totalorder %s149_s8, %s149_s8 }
  0x1e   :  { %p156_p0 = por %p155_p13, %p154_p12 }
  0x20   :  { %p157_p1 = pnand %p156_p0, %p150_p11 }
  0x22   :  { %160 = shalt.err (!%p157_p1)
}
  0x23   :  { %42 = dma.hbm_to_vmem [thread:$0]  %s297_s1, 256, %s37_s27, [#allocation6], %s214_s22, %s214_s22, %s215_s23  }
  0x24   :  { %205 = dma.done.wait [#allocation3], 256  }
  0x25   :  { %206 = vsyncadd [#allocation3], 4294967040 }
  0x26   :  { %207 = dma.done.wait [#allocation6], 256  }
  0x27   :  { %208 = vsyncadd [#allocation6], 4294967040  ;;  %v58_v0 = vld [vmem:[#allocation2] sm:$0xff]  ;;  %v59_v1 = vld [vmem:[#allocation2 + $0x8] sm:$0xff]  ;;  %s217_s10 = smov [#allocation8]   ;;  %s218_s12 = smov [#allocation7]  }
  0x28   :  { %v60_v2 = vld [vmem:[#allocation5] sm:$0xff]  ;;  %v61_v3 = vld [vmem:[#allocation5 + $0x8] sm:$0xff]  ;;  %s93_s11 = sshll.u32 %s217_s10, 4  ;;  %s84_s13 = sshll.u32 %s218_s12, 4  ;;  %s94_s11 = int_to_ptr.vmem [resolvable:$true] %s93_s11  ;;  %s85_s13 = int_to_ptr.vmem [resolvable:$true] %s84_s13 }
  0x29   :  { %v62_v4 = vsub.f32 %v58_v0, %v60_v2  ;;  %v63_v5 = vsub.f32 %v59_v1, %v61_v3  ;;  %s161_s1 = scalar_lea.vmem %s94_s11, 256  ;;  %p166_p3 = scmp.lt.s32.totalorder %s94_s11, %s94_s11 }
  0x2a   :  { %p162_p2 = scmp.ne.s32.totalorder %s94_s11, %s161_s1  ;;  %p167_p4 = scmp.lt.s32.totalorder %s161_s1, %s161_s1 }
  0x2b   :  { %v64_v6 = vmul.f32 %v62_v4, %v62_v4  ;;  %v66_v7 = vand.u32 2147483647, %v62_v4  ;;  %v65_v8 = vmul.f32 %v63_v5, %v63_v5  ;;  %v67_v9 = vand.u32 2147483647, %v63_v5 }
  0x2c   :  { %p168_p5 = por %p167_p4, %p166_p3 }
  0x2d   :  { %v74_v10 = vmax.f32 %v66_v7, 0.0  ;;  %v68_v11 = vadd.f32 %v65_v8, %v64_v6  ;;  %v75_v12 = vmax.f32 %v67_v9, 0.0 }
  0x2e   :  { %p169_p6 = pnand %p168_p5, %p162_p2 }
  0x2f   :  { %76 = vst [vmem:[#allocation8] sm:$0xff] %v74_v10  ;;  %77 = vst [vmem:[#allocation8 + $0x8] sm:$0xff] %v75_v12 }
  0x30   :  { %172 = shalt.err (!%p169_p6)
}
  0x31   :  { %s173_s16 = scalar_lea.hbm %s299_s3, 256 }
  0x32   :  { %p174_p7 = scmp.ne.s32.totalorder %s299_s3, %s173_s16  ;;  %p177_p8 = scmp.lt.u32.totalorder %s173_s16, %s299_s3 }
  0x34   :  { %p179_p9 = pnand %p177_p8, %p174_p7 }
  0x36   :  { %182 = shalt.err (!%p179_p9)
}
  0x37   :  { %99 = dma.vmem_to_hbm [thread:$0]  %s94_s11, 256, %s299_s3, [#allocation9], %s214_s22, %s214_s22, %s215_s23   ;;  %71 = vst [vmem:[#allocation7] sm:$0xff] %v68_v11 }
  0x38   :  { %s183_s25 = scalar_lea.vmem %s85_s13, 128  ;;  %p188_p11 = scmp.lt.s32.totalorder %s85_s13, %s85_s13 }
  0x39   :  { %p184_p10 = scmp.ne.s32.totalorder %s85_s13, %s183_s25  ;;  %p189_p12 = scmp.lt.s32.totalorder %s183_s25, %s183_s25 }
  0x3b   :  { %p190_p13 = por %p189_p12, %p188_p11 }
  0x3d   :  { %p191_p0 = pnand %p190_p13, %p184_p10 }
  0x3f   :  { %194 = shalt.err (!%p191_p0)
}
  0x40   :  { %s195_s28 = scalar_lea.hbm %s298_s2, 128 }
  0x41   :  { %p196_p1 = scmp.ne.s32.totalorder %s298_s2, %s195_s28  ;;  %p199_p2 = scmp.lt.u32.totalorder %s195_s28, %s298_s2 }
  0x43   :  { %p201_p3 = pnand %p199_p2, %p196_p1 }
  0x45   :  { %204 = shalt.err (!%p201_p3)
}
  0x46   :  { %87 = dma.vmem_to_hbm [thread:$0]  %s85_s13, 128, %s298_s2, [#allocation4]  }
  0x47   :  { %209 = dma.done.wait [#allocation4], 128  }
  0x48   :  { %210 = vsyncadd [#allocation4], 4294967168 }
  0x49   :  { %211 = dma.done.wait [#allocation9], 256  }
  0x4a   :  { %212 = vsyncadd [#allocation9], 4294967040 }
  0x4b   :  { %106 = vsyncpa [#allocation3], 1 }
  0x4c   :  { %107 = vsyncpa [#allocation6], 1 }
  0x4d   :  { %108 = vsyncpa [#allocation4], 1 }
  0x4e   :  { %109 = vsyncpa [#allocation9], 1 }

</bundles_post_ra>
